<compile_context>
chip_gen: v5e
topology: v5e:2x2
jax: 0.10.0
libtpu: 0.0.40
codegen_flags: <defaults>
</compile_context>

<pallas_src>
import functools

import jax
import jax.numpy as jnp
from jax import lax
from jax.experimental import pallas as pl
from jax.experimental.pallas import tpu as pltpu

D_MODEL = 768
D_BOTTLE = 64


def _adapter_kernel(x_ref, w1_ref, b1_ref, w2_ref, b2_ref, o_ref):
    # x_ref: (TM, 768), w1_ref: (768, 64), b1_ref: (1, 64) f32,
    # w2_ref: (64, 768), b2_ref: (1, 768) f32, o_ref: (TM, 768)

    # dense1: 768 -> 64 on the MXU (bf16 or f32 operands, f32 accumulation).
    # Read + cast x inline so the f32 tile is not kept live across the body.
    h = jnp.dot(x_ref[...].astype(w1_ref.dtype), w1_ref[...],
                preferred_element_type=jnp.float32) + b1_ref[...]

    # exact GELU (erf form, matches nn.GELU() default) in f32
    inv_sqrt2 = jnp.float32(0.7071067811865476)
    h = 0.5 * h * (1.0 + lax.erf(h * inv_sqrt2))

    # dense2: 64 -> 768 on the MXU (f32 accumulation)
    y = jnp.dot(h.astype(w2_ref.dtype), w2_ref[...],
                preferred_element_type=jnp.float32) + b2_ref[...]

    # residual in f32 (re-read x_ref rather than holding it)
    o_ref[...] = (x_ref[...].astype(jnp.float32) + y).astype(o_ref.dtype)


@functools.partial(jax.jit, static_argnames=("block_rows", "use_bf16"))
def adapter_forward(x, w1, b1, w2, b2, *, block_rows=1024, use_bf16=True):
    """x: (..., 768). Returns same shape/dtype as x."""
    orig_shape = x.shape
    x2 = x.reshape(-1, D_MODEL)
    n = x2.shape[0]

    # --- row-tile selection (no wrapper-side padding; ragged blocks are
    # handled by Pallas' masked partial-block read/writeback) ---
    if n <= 8:
        # Block equal to the full array extent: allowed regardless of
        # 8-alignment, and trivially one grid step.
        tm = n
    else:
        tm = min(block_rows, n)
        tm = max(8, (tm // 8) * 8)              # multiple of the f32 sublane
        if n >= 512:
            # Guarantee grid >= 2 (both v7x TensorCores get work) and balance
            # ragged splits, as long as tiles stay >= ~256 rows.
            half = (((n + 1) // 2 + 7) // 8) * 8
            tm = min(tm, half)
    grid = (pl.cdiv(n, tm),)

    # VMEM budget: tm=1024 needs ~20-24 MiB (double-buffered in/out +
    # intermediates); tm=2048 needs ~40-45 MiB.  Stay under v7x's 64 MiB.
    vmem_limit = (48 if tm > 1024 else 32) * 1024 * 1024

    w_dtype = jnp.bfloat16 if use_bf16 else jnp.float32
    w1c = w1.astype(w_dtype)
    w2c = w2.astype(w_dtype)
    b1_2d = b1.reshape(1, D_BOTTLE).astype(jnp.float32)
    b2_2d = b2.reshape(1, D_MODEL).astype(jnp.float32)

    itemsize = jnp.dtype(x.dtype).itemsize
    cost = pl.CostEstimate(
        flops=4 * n * D_MODEL * D_BOTTLE,                        # two matmuls
        transcendentals=n * D_BOTTLE,                            # erf in GELU
        bytes_accessed=(2 * n * D_MODEL * itemsize               # x in, out
                        + 2 * D_MODEL * D_BOTTLE * jnp.dtype(w_dtype).itemsize
                        + 4 * (D_MODEL + D_BOTTLE)),             # biases (f32)
    )

    out = pl.pallas_call(
        _adapter_kernel,
        out_shape=jax.ShapeDtypeStruct((n, D_MODEL), x.dtype),
        grid_spec=pltpu.PrefetchScalarGridSpec(
            num_scalar_prefetch=0,
            grid=grid,
            in_specs=[
                pl.BlockSpec((tm, D_MODEL), lambda i: (i, 0)),        # x tile
                pl.BlockSpec((D_MODEL, D_BOTTLE), lambda i: (0, 0)),  # W1
                pl.BlockSpec((1, D_BOTTLE), lambda i: (0, 0)),        # b1
                pl.BlockSpec((D_BOTTLE, D_MODEL), lambda i: (0, 0)),  # W2
                pl.BlockSpec((1, D_MODEL), lambda i: (0, 0)),         # b2
            ],
            out_specs=pl.BlockSpec((tm, D_MODEL), lambda i: (i, 0)),
        ),
        compiler_params=pltpu.CompilerParams(
            dimension_semantics=("parallel",),      # grid >= 2 -> both v7x TCs
            vmem_limit_bytes=vmem_limit,
        ),
        cost_estimate=cost,
    )(x2, w1c, b1_2d, w2c, b2_2d)

    return out.reshape(orig_shape)


def init_params(key):
    """Deterministic Linear params, PyTorch-style uniform(-1/sqrt(fan_in), ...)."""
    k1, k2, k3, k4 = jax.random.split(key, 4)
    bound1 = 1.0 / jnp.sqrt(jnp.float32(D_MODEL))
    bound2 = 1.0 / jnp.sqrt(jnp.float32(D_BOTTLE))
    # stored as (in, out) so the kernel does x @ W (== PyTorch x @ W.T)
    w1 = jax.random.uniform(k1, (D_MODEL, D_BOTTLE), jnp.float32, -bound1, bound1)
    b1 = jax.random.uniform(k2, (D_BOTTLE,), jnp.float32, -bound1, bound1)
    w2 = jax.random.uniform(k3, (D_BOTTLE, D_MODEL), jnp.float32, -bound2, bound2)
    b2 = jax.random.uniform(k4, (D_MODEL,), jnp.float32, -bound2, bound2)
    return w1, b1, w2, b2


def reference_forward(x, w1, b1, w2, b2):
    h = jax.nn.gelu(x @ w1 + b1, approximate=False)
    return x + (h @ w2 + b2)


if __name__ == "__main__":
    key = jax.random.PRNGKey(0)
    kx, kp = jax.random.split(key)

    batch, seq = 2, 8
    x = jax.random.normal(kx, (batch, seq, D_MODEL), jnp.float32)
    w1, b1, w2, b2 = init_params(kp)

    ref = reference_forward(x, w1, b1, w2, b2)

    # Exact f32 path: strict check against the f32 reference.
    out_f32 = jax.block_until_ready(
        adapter_forward(x, w1, b1, w2, b2, use_bf16=False))
    assert out_f32.shape == x.shape
    assert jnp.allclose(out_f32, ref, atol=1e-4, rtol=1e-4), "f32 mismatch"

    # Default fast path: bf16 MXU operands, f32 accumulation/bias/GELU/residual.
    out_fast = jax.block_until_ready(adapter_forward(x, w1, b1, w2, b2))
    assert out_fast.shape == x.shape
    assert jnp.allclose(out_fast, ref, atol=2e-2, rtol=2e-2), "bf16 mismatch"

    # Ragged row count (not a multiple of 8): exercises the no-pad masked
    # partial-block path end to end.
    x_ragged = jax.random.normal(kx, (13, D_MODEL), jnp.float32)
    out_ragged = jax.block_until_ready(
        adapter_forward(x_ragged, w1, b1, w2, b2, use_bf16=False))
    ref_ragged = reference_forward(x_ragged, w1, b1, w2, b2)
    assert jnp.allclose(out_ragged, ref_ragged, atol=1e-4, rtol=1e-4), \
        "ragged mismatch"

    print("KERNEL_OK")
</pallas_src>

<mosaic_0001>
module attributes {stable_mosaic.version = 11 : i64} {
  func.func @_adapter_kernel(%arg0: i32, %arg1: memref<16x768xf32, #tpu.memory_space<vmem>>, %arg2: memref<768x64xf32, #tpu.memory_space<vmem>>, %arg3: memref<1x64xf32, #tpu.memory_space<vmem>>, %arg4: memref<64x768xf32, #tpu.memory_space<vmem>>, %arg5: memref<1x768xf32, #tpu.memory_space<vmem>>, %arg6: memref<16x768xf32, #tpu.memory_space<vmem>>) attributes {dimension_semantics = [#tpu.dimension_semantics<parallel>], iteration_bounds = array<i64: 1>, scalar_prefetch = 0 : i64, scratch_operands = 0 : i64, tpu.core_type = #tpu.core_type<tc>, window_params = [{transform_indices = @transform_0, window_bounds = array<i64: 16, 768>}, {pipeline_mode = #tpu.pipeline_mode<synchronous>, transform_indices = @transform_1, window_bounds = array<i64: 768, 64>}, {pipeline_mode = #tpu.pipeline_mode<synchronous>, transform_indices = @transform_2, window_bounds = array<i64: 1, 64>}, {pipeline_mode = #tpu.pipeline_mode<synchronous>, transform_indices = @transform_3, window_bounds = array<i64: 64, 768>}, {pipeline_mode = #tpu.pipeline_mode<synchronous>, transform_indices = @transform_4, window_bounds = array<i64: 1, 768>}, {transform_indices = @transform_5, window_bounds = array<i64: 16, 768>}]} {
    %c0 = arith.constant 0 : index
    %c0_0 = arith.constant 0 : index
    %0 = vector.load %arg1[%c0, %c0_0] : memref<16x768xf32, #tpu.memory_space<vmem>>, vector<16x768xf32>
    %c0_1 = arith.constant 0 : index
    %c0_2 = arith.constant 0 : index
    %1 = vector.load %arg2[%c0_1, %c0_2] : memref<768x64xf32, #tpu.memory_space<vmem>>, vector<768x64xf32>
    %cst = arith.constant dense<0.000000e+00> : vector<16x64xf32>
    %2 = tpu.matmul %0, %1, %cst {dimension_numbers = #tpu.dot_dimension_numbers<[1], [0], [0], [1], [0, 0, 1, 1], [], []>} : vector<16x768xf32>, vector<768x64xf32>, vector<16x64xf32> -> vector<16x64xf32>
    %c0_3 = arith.constant 0 : index
    %c0_4 = arith.constant 0 : index
    %3 = vector.load %arg3[%c0_3, %c0_4] : memref<1x64xf32, #tpu.memory_space<vmem>>, vector<1x64xf32>
    %4 = vector.broadcast %3 : vector<1x64xf32> to vector<16x64xf32>
    %5 = arith.addf %2, %4 : vector<16x64xf32>
    %cst_5 = arith.constant 5.000000e-01 : f32
    %6 = vector.broadcast %cst_5 : f32 to vector<16x64xf32>
    %7 = arith.mulf %6, %5 : vector<16x64xf32>
    %cst_6 = arith.constant 0.707106769 : f32
    %8 = vector.broadcast %cst_6 : f32 to vector<16x64xf32>
    %9 = arith.mulf %5, %8 : vector<16x64xf32>
    %10 = math.erf %9 : vector<16x64xf32>
    %cst_7 = arith.constant 1.000000e+00 : f32
    %11 = vector.broadcast %cst_7 : f32 to vector<16x64xf32>
    %12 = arith.addf %11, %10 : vector<16x64xf32>
    %13 = arith.mulf %7, %12 : vector<16x64xf32>
    %c0_8 = arith.constant 0 : index
    %c0_9 = arith.constant 0 : index
    %14 = vector.load %arg4[%c0_8, %c0_9] : memref<64x768xf32, #tpu.memory_space<vmem>>, vector<64x768xf32>
    %cst_10 = arith.constant dense<0.000000e+00> : vector<16x768xf32>
    %15 = tpu.matmul %13, %14, %cst_10 {dimension_numbers = #tpu.dot_dimension_numbers<[1], [0], [0], [1], [0, 0, 1, 1], [], []>} : vector<16x64xf32>, vector<64x768xf32>, vector<16x768xf32> -> vector<16x768xf32>
    %c0_11 = arith.constant 0 : index
    %c0_12 = arith.constant 0 : index
    %16 = vector.load %arg5[%c0_11, %c0_12] : memref<1x768xf32, #tpu.memory_space<vmem>>, vector<1x768xf32>
    %17 = vector.broadcast %16 : vector<1x768xf32> to vector<16x768xf32>
    %18 = arith.addf %15, %17 : vector<16x768xf32>
    %c0_13 = arith.constant 0 : index
    %c0_14 = arith.constant 0 : index
    %19 = vector.load %arg1[%c0_13, %c0_14] : memref<16x768xf32, #tpu.memory_space<vmem>>, vector<16x768xf32>
    %20 = arith.addf %19, %18 : vector<16x768xf32>
    %c0_15 = arith.constant 0 : index
    %c0_16 = arith.constant 0 : index
    %21 = vector.load %arg6[%c0_15, %c0_16] : memref<16x768xf32, #tpu.memory_space<vmem>>, vector<16x768xf32>
    tpu.vector_store %arg6[%c0_15, %c0_16], %20 {strides = array<i32>} : memref<16x768xf32, #tpu.memory_space<vmem>>, vector<16x768xf32>,
    return
  }
  func.func @transform_0(%arg0: i32) -> (i32, i32) {
    %c0_i32 = arith.constant 0 : i32
    %c0_i32_0 = arith.constant 0 : i32
    return %arg0, %c0_i32 : i32, i32
  }
  func.func @transform_1(%arg0: i32) -> (i32, i32) {
    %c0_i32 = arith.constant 0 : i32
    %c0_i32_0 = arith.constant 0 : i32
    %c0_i32_1 = arith.constant 0 : i32
    return %c0_i32, %c0_i32_0 : i32, i32
  }
  func.func @transform_2(%arg0: i32) -> (i32, i32) {
    %c0_i32 = arith.constant 0 : i32
    %c0_i32_0 = arith.constant 0 : i32
    %c0_i32_1 = arith.constant 0 : i32
    return %c0_i32, %c0_i32_0 : i32, i32
  }
  func.func @transform_3(%arg0: i32) -> (i32, i32) {
    %c0_i32 = arith.constant 0 : i32
    %c0_i32_0 = arith.constant 0 : i32
    %c0_i32_1 = arith.constant 0 : i32
    return %c0_i32, %c0_i32_0 : i32, i32
  }
  func.func @transform_4(%arg0: i32) -> (i32, i32) {
    %c0_i32 = arith.constant 0 : i32
    %c0_i32_0 = arith.constant 0 : i32
    %c0_i32_1 = arith.constant 0 : i32
    return %c0_i32, %c0_i32_0 : i32, i32
  }
  func.func @transform_5(%arg0: i32) -> (i32, i32) {
    %c0_i32 = arith.constant 0 : i32
    %c0_i32_0 = arith.constant 0 : i32
    return %arg0, %c0_i32 : i32, i32
  }
}

</mosaic_0001>

<bundles_post_ra>
// kernel: adapter_forward.1
= control target key start
LH: loop header
LB: loop body
LE: loop exit
PB: predicated region body
PF: predicated region fallthrough
CT: control target
= control target key end

     0   :  { %s1348_s0 = inlined_call_operand.vmem [shape: f32[16,768], index: 0, kind: input, shape index: {}]   ;;  %s1349_s1 = inlined_call_operand.vmem [shape: f32[768,64], index: 1, kind: input, shape index: {}]   ;;  %s1350_s2 = inlined_call_operand.vmem [shape: f32[1,64], index: 2, kind: input, shape index: {}]   ;;  %s1351_s3 = inlined_call_operand.vmem [shape: f32[64,768], index: 3, kind: input, shape index: {}]   ;;  %s1352_s4 = inlined_call_operand.vmem [shape: f32[1,768], index: 4, kind: input, shape index: {}]   ;;  %s1353_s5 = inlined_call_operand.hbm [shape: f32[16,768], index: 5, kind: output, shape index: {}]  }
   0x1   :  { %v48_v0 = vld [vmem:[%s1349_s1 + $0x78] sm:$0xff]  ;;  %v47_v1 = vld [vmem:[%s1349_s1 + $0x70] sm:$0xff]  ;;  %v46_v4 = vld [vmem:[%s1349_s1 + $0x68] sm:$0xff] }
   0x2   :  { %v64_v2 = vld [vmem:[%s1349_s1 + $0xf8] sm:$0xff]  ;;  %133 = vmatpush.msra.mxu0 %v48_v0  ;;  %v63_v3 = vld [vmem:[%s1349_s1 + $0xf0] sm:$0xff]  ;;  %v62_v5 = vld [vmem:[%s1349_s1 + $0xe8] sm:$0xff] }
   0x3   :  { %156 = vmatpush.msra.mxu1 %v64_v2  ;;  %v45_v6 = vld [vmem:[%s1349_s1 + $0x60] sm:$0xff]  ;;  %v80_v8 = vld [vmem:[%s1349_s1 + $0x178] sm:$0xff]  ;;  %v79_v9 = vld [vmem:[%s1349_s1 + $0x170] sm:$0xff] }
   0x4   :  { %134 = vmatpush.msra.mxu0 %v47_v1  ;;  %v61_v7 = vld [vmem:[%s1349_s1 + $0xe0] sm:$0xff]  ;;  %v96_v10 = vld [vmem:[%s1349_s1 + $0x1f8] sm:$0xff]  ;;  %179 = vmatpush.msra.mxu2 %v80_v8  ;;  %v78_v13 = vld [vmem:[%s1349_s1 + $0x168] sm:$0xff] }
   0x5   :  { %157 = vmatpush.msra.mxu1 %v63_v3  ;;  %v44_v11 = vld [vmem:[%s1349_s1 + $0x58] sm:$0xff]  ;;  %202 = vmatpush.msra.mxu3 %v96_v10  ;;  %v95_v14 = vld [vmem:[%s1349_s1 + $0x1f0] sm:$0xff]  ;;  %v94_v17 = vld [vmem:[%s1349_s1 + $0x1e8] sm:$0xff] }
   0x6   :  { %135 = vmatpush.msra.mxu0 %v46_v4  ;;  %v60_v12 = vld [vmem:[%s1349_s1 + $0xd8] sm:$0xff]  ;;  %v43_v15 = vld [vmem:[%s1349_s1 + $0x50] sm:$0xff]  ;;  %180 = vmatpush.msra.mxu2 %v79_v9  ;;  %v77_v18 = vld [vmem:[%s1349_s1 + $0x160] sm:$0xff] }
   0x7   :  { %158 = vmatpush.msra.mxu1 %v62_v5  ;;  %v59_v16 = vld [vmem:[%s1349_s1 + $0xd0] sm:$0xff]  ;;  %203 = vmatpush.msra.mxu3 %v95_v14  ;;  %v93_v19 = vld [vmem:[%s1349_s1 + $0x1e0] sm:$0xff]  ;;  %v42_v20 = vld [vmem:[%s1349_s1 + $0x48] sm:$0xff] }
   0x8   :  { %136 = vmatpush.msra.mxu0 %v45_v6  ;;  %v58_v21 = vld [vmem:[%s1349_s1 + $0xc8] sm:$0xff]  ;;  %181 = vmatpush.msra.mxu2 %v78_v13  ;;  %v76_v22 = vld [vmem:[%s1349_s1 + $0x158] sm:$0xff]  ;;  %v41_v24 = vld [vmem:[%s1349_s1 + $0x40] sm:$0xff] }
   0x9   :  { %159 = vmatpush.msra.mxu1 %v61_v7  ;;  %204 = vmatpush.msra.mxu3 %v94_v17  ;;  %v92_v23 = vld [vmem:[%s1349_s1 + $0x1d8] sm:$0xff]  ;;  %v57_v25 = vld [vmem:[%s1349_s1 + $0xc0] sm:$0xff]  ;;  %v75_v26 = vld [vmem:[%s1349_s1 + $0x150] sm:$0xff] }
   0xa   :  { %137 = vmatpush.msra.mxu0 %v44_v11  ;;  %182 = vmatpush.msra.mxu2 %v77_v18  ;;  %v91_v27 = vld [vmem:[%s1349_s1 + $0x1d0] sm:$0xff]  ;;  %v40_v28 = vld [vmem:[%s1349_s1 + $0x38] sm:$0xff]  ;;  %v74_v30 = vld [vmem:[%s1349_s1 + $0x148] sm:$0xff] }
   0xb   :  { %160 = vmatpush.msra.mxu1 %v60_v12  ;;  %205 = vmatpush.msra.mxu3 %v93_v19  ;;  %v56_v29 = vld [vmem:[%s1349_s1 + $0xb8] sm:$0xff]  ;;  %v90_v31 = vld [vmem:[%s1349_s1 + $0x1c8] sm:$0xff]  ;;  %v39_v32 = vld [vmem:[%s1349_s1 + $0x30] sm:$0xff] }
   0xc   :  { %138 = vmatpush.msra.mxu0 %v43_v15  ;;  %183 = vmatpush.msra.mxu2 %v76_v22  ;;  %v55_v33 = vld [vmem:[%s1349_s1 + $0xb0] sm:$0xff]  ;;  %v73_v34 = vld [vmem:[%s1349_s1 + $0x140] sm:$0xff]  ;;  %v38_v36 = vld [vmem:[%s1349_s1 + $0x28] sm:$0xff] }
   0xd   :  { %161 = vmatpush.msra.mxu1 %v59_v16  ;;  %206 = vmatpush.msra.mxu3 %v92_v23  ;;  %v89_v35 = vld [vmem:[%s1349_s1 + $0x1c0] sm:$0xff]  ;;  %v54_v37 = vld [vmem:[%s1349_s1 + $0xa8] sm:$0xff]  ;;  %v72_v38 = vld [vmem:[%s1349_s1 + $0x138] sm:$0xff] }
   0xe   :  { %139 = vmatpush.msra.mxu0 %v42_v20  ;;  %184 = vmatpush.msra.mxu2 %v75_v26  ;;  %v88_v39 = vld [vmem:[%s1349_s1 + $0x1b8] sm:$0xff]  ;;  %v37_v40 = vld [vmem:[%s1349_s1 + $0x20] sm:$0xff]  ;;  %v71_v42 = vld [vmem:[%s1349_s1 + $0x130] sm:$0xff] }
   0xf   :  { %162 = vmatpush.msra.mxu1 %v58_v21  ;;  %207 = vmatpush.msra.mxu3 %v91_v27  ;;  %v53_v41 = vld [vmem:[%s1349_s1 + $0xa0] sm:$0xff]  ;;  %v87_v43 = vld [vmem:[%s1349_s1 + $0x1b0] sm:$0xff]  ;;  %v36_v44 = vld [vmem:[%s1349_s1 + $0x18] sm:$0xff] }
  0x10   :  { %140 = vmatpush.msra.mxu0 %v41_v24  ;;  %185 = vmatpush.msra.mxu2 %v74_v30  ;;  %v52_v45 = vld [vmem:[%s1349_s1 + $0x98] sm:$0xff]  ;;  %v70_v46 = vld [vmem:[%s1349_s1 + $0x128] sm:$0xff]  ;;  %v35_v48 = vld [vmem:[%s1349_s1 + $0x10] sm:$0xff] }
  0x11   :  { %163 = vmatpush.msra.mxu1 %v57_v25  ;;  %208 = vmatpush.msra.mxu3 %v90_v31  ;;  %v86_v47 = vld [vmem:[%s1349_s1 + $0x1a8] sm:$0xff]  ;;  %v51_v49 = vld [vmem:[%s1349_s1 + $0x90] sm:$0xff]  ;;  %v69_v50 = vld [vmem:[%s1349_s1 + $0x120] sm:$0xff] }
  0x12   :  { %141 = vmatpush.msra.mxu0 %v40_v28  ;;  %186 = vmatpush.msra.mxu2 %v73_v34  ;;  %v85_v51 = vld [vmem:[%s1349_s1 + $0x1a0] sm:$0xff]  ;;  %v34_v52 = vld [vmem:[%s1349_s1 + $0x8] sm:$0xff]  ;;  %v68_v54 = vld [vmem:[%s1349_s1 + $0x118] sm:$0xff] }
  0x13   :  { %164 = vmatpush.msra.mxu1 %v56_v29  ;;  %209 = vmatpush.msra.mxu3 %v89_v35  ;;  %v50_v53 = vld [vmem:[%s1349_s1 + $0x88] sm:$0xff]  ;;  %v84_v55 = vld [vmem:[%s1349_s1 + $0x198] sm:$0xff]  ;;  %v33_v56 = vld [vmem:[%s1349_s1] sm:$0xff] }
  0x14   :  { %142 = vmatpush.msra.mxu0 %v39_v32  ;;  %187 = vmatpush.msra.mxu2 %v72_v38  ;;  %v49_v57 = vld [vmem:[%s1349_s1 + $0x80] sm:$0xff]  ;;  %v112_v58 = vld [vmem:[%s1349_s1 + $0x278] sm:$0xff]  ;;  %v67_v60 = vld [vmem:[%s1349_s1 + $0x110] sm:$0xff] }
  0x15   :  { %165 = vmatpush.msra.mxu1 %v55_v33  ;;  %210 = vmatpush.msra.mxu3 %v88_v39  ;;  %v128_v59 = vld [vmem:[%s1349_s1 + $0x2f8] sm:$0xff]  ;;  %v83_v61 = vld [vmem:[%s1349_s1 + $0x190] sm:$0xff]  ;;  %v66_v0 = vld [vmem:[%s1349_s1 + $0x108] sm:$0xff] }
  0x16   :  { %143 = vmatpush.msra.mxu0 %v38_v36  ;;  %188 = vmatpush.msra.mxu2 %v71_v42  ;;  %v111_v62 = vld [vmem:[%s1349_s1 + $0x270] sm:$0xff]  ;;  %v82_v1 = vld [vmem:[%s1349_s1 + $0x188] sm:$0xff]  ;;  %v65_v4 = vld [vmem:[%s1349_s1 + $0x100] sm:$0xff] }
  0x17   :  { %166 = vmatpush.msra.mxu1 %v54_v37  ;;  %211 = vmatpush.msra.mxu3 %v87_v43  ;;  %v127_v63 = vld [vmem:[%s1349_s1 + $0x2f0] sm:$0xff]  ;;  %v110_v2 = vld [vmem:[%s1349_s1 + $0x268] sm:$0xff]  ;;  %v81_v5 = vld [vmem:[%s1349_s1 + $0x180] sm:$0xff] }
  0x18   :  { %144 = vmatpush.msra.mxu0 %v37_v40  ;;  %189 = vmatpush.msra.mxu2 %v70_v46  ;;  %v126_v3 = vld [vmem:[%s1349_s1 + $0x2e8] sm:$0xff]  ;;  %v109_v6 = vld [vmem:[%s1349_s1 + $0x260] sm:$0xff]  ;;  %v924_v8 = vld [vmem:[%s1348_s0 + $0x10] sm:$0xff] }
  0x19   :  { %167 = vmatpush.msra.mxu1 %v53_v41  ;;  %212 = vmatpush.msra.mxu3 %v86_v47  ;;  %v125_v7 = vld [vmem:[%s1349_s1 + $0x2e0] sm:$0xff] }
  0x1a   :  { %145 = vmatpush.msra.mxu0 %v36_v44  ;;  %190 = vmatpush.msra.mxu2 %v69_v50  ;;  %v929_v9 = vld [vmem:[%s1348_s0] sm:$0xff] }
  0x1b   :  { %168 = vmatpush.msra.mxu1 %v52_v45  ;;  %213 = vmatpush.msra.mxu3 %v85_v51 }
  0x1c   :  { %146 = vmatpush.msra.mxu0 %v35_v48  ;;  %191 = vmatpush.msra.mxu2 %v68_v54 }
  0x1d   :  { %169 = vmatpush.msra.mxu1 %v51_v49  ;;  %214 = vmatpush.msra.mxu3 %v84_v55 }
  0x1e   :  { %147 = vmatpush.msra.mxu0 %v34_v52  ;;  %192 = vmatpush.msra.mxu2 %v67_v60 }
  0x1f   :  { %170 = vmatpush.msra.mxu1 %v50_v53  ;;  %215 = vmatpush.msra.mxu3 %v83_v61 }
  0x20   :  { %148 = vmatpush.msra.mxu0 %v33_v56  ;;  %193 = vmatpush.msra.mxu2 %v66_v0 }
  0x21   :  { %171 = vmatpush.msra.mxu1 %v49_v57  ;;  %216 = vmatpush.msra.mxu3 %v82_v1 }
  0x22   :  { %225 = vmatpush.msrb.mxu0 %v112_v58 }
  0x23   :  { %248 = vmatpush.msrb.mxu1 %v128_v59 }
  0x24   :  { %226 = vmatpush.msrb.mxu0 %v111_v62 }
  0x25   :  { %249 = vmatpush.msrb.mxu1 %v127_v63 }
  0x26   :  { %227 = vmatpush.msrb.mxu0 %v110_v2 }
  0x27   :  { %250 = vmatpush.msrb.mxu1 %v126_v3 }
  0x28   :  { %10 = vsyncpa [#allocation3], 0  ;;  %v108_v10 = vld [vmem:[%s1349_s1 + $0x258] sm:$0xff]  ;;  %194 = vmatpush.msra.mxu2 %v65_v4  ;;  %217 = vmatpush.msra.mxu3 %v81_v5  ;;  %v945_v13 = vld [vmem:[%s1348_s0 + $0x8] sm:$0xff]  ;;  %vm421_vm6 = vcmask 523264   ;;  %s596_s24 = sshll.u32 %s1353_s5, 4  ;;  %s597_s24 = int_to_ptr.hbm [resolvable:$true] %s596_s24 }
  0x29   :  { %v124_v11 = vld [vmem:[%s1349_s1 + $0x2d8] sm:$0xff]  ;;  %228 = vmatpush.msrb.mxu0 %v109_v6  ;;  %251 = vmatpush.msrb.mxu1 %v125_v7  ;;  %v107_v14 = vld [vmem:[%s1349_s1 + $0x250] sm:$0xff]  ;;  %v106_v16 = vld [vmem:[%s1349_s1 + $0x248] sm:$0xff]  ;;  %s673_s25 = smov 768   ;;  %s674_s26 = smov 48  }
  0x2a   :  { %v940_v12 = vld [vmem:[%s1348_s0 + $0x18] sm:$0xff]  ;;  %v123_v15 = vld [vmem:[%s1349_s1 + $0x2d0] sm:$0xff]  ;;  %195 = vmatmul.f32.vlgmr.msra.gmra.mxu2 %v924_v8  ;;  %149 = vmatmul.f32.vlgmr.msra.gmra.mxu0 %v929_v9  ;;  %v122_v17 = vld [vmem:[%s1349_s1 + $0x2c8] sm:$0xff] }
  0x2b   :  { %229 = vmatpush.msrb.mxu0 %v108_v10  ;;  %252 = vmatpush.msrb.mxu1 %v124_v11  ;;  %v105_v18 = vld [vmem:[%s1349_s1 + $0x240] sm:$0xff]  ;;  %v977_v21 = vld [vmem:[%s1348_s0 + $0x30] sm:$0xff]  ;;  %v104_v22 = vld [vmem:[%s1349_s1 + $0x238] sm:$0xff] }
  0x2c   :  { %218 = vmatmul.f32.vlgmr.msra.gmra.mxu3 %v940_v12  ;;  %172 = vmatmul.f32.vlgmr.msra.gmra.mxu1 %v945_v13  ;;  %v121_v19 = vld [vmem:[%s1349_s1 + $0x2c0] sm:$0xff]  ;;  %v120_v23 = vld [vmem:[%s1349_s1 + $0x2b8] sm:$0xff]  ;;  %v988_v24 = vld [vmem:[%s1348_s0 + $0x48] sm:$0xff] }
  0x2d   :  { %230 = vmatpush.msrb.mxu0 %v107_v14  ;;  %253 = vmatpush.msrb.mxu1 %v123_v15  ;;  %v972_v20 = vld [vmem:[%s1348_s0 + $0x40] sm:$0xff]  ;;  %v993_v25 = vld [vmem:[%s1348_s0 + $0x38] sm:$0xff]  ;;  %v103_v26 = vld [vmem:[%s1349_s1 + $0x230] sm:$0xff] }
  0x2e   :  { %v119_v27 = vld [vmem:[%s1349_s1 + $0x2b0] sm:$0xff]  ;;  %v102_v28 = vld [vmem:[%s1349_s1 + $0x228] sm:$0xff]  ;;  %v101_v30 = vld [vmem:[%s1349_s1 + $0x220] sm:$0xff] }
  0x2f   :  { %231 = vmatpush.msrb.mxu0 %v106_v16  ;;  %254 = vmatpush.msrb.mxu1 %v122_v17  ;;  %v118_v29 = vld [vmem:[%s1349_s1 + $0x2a8] sm:$0xff]  ;;  %v117_v31 = vld [vmem:[%s1349_s1 + $0x2a0] sm:$0xff]  ;;  %v100_v32 = vld [vmem:[%s1349_s1 + $0x218] sm:$0xff] }
  0x30   :  { %v116_v33 = vld [vmem:[%s1349_s1 + $0x298] sm:$0xff]  ;;  %v99_v34 = vld [vmem:[%s1349_s1 + $0x210] sm:$0xff]  ;;  %v98_v36 = vld [vmem:[%s1349_s1 + $0x208] sm:$0xff] }
  0x31   :  { %232 = vmatpush.msrb.mxu0 %v105_v18  ;;  %255 = vmatpush.msrb.mxu1 %v121_v19  ;;  %v115_v35 = vld [vmem:[%s1349_s1 + $0x290] sm:$0xff]  ;;  %v114_v37 = vld [vmem:[%s1349_s1 + $0x288] sm:$0xff]  ;;  %v97_v38 = vld [vmem:[%s1349_s1 + $0x200] sm:$0xff] }
  0x32   :  { %198 = vmatmul.f32.gmra.mxu2 %v972_v20  ;;  %152 = vmatmul.f32.gmra.mxu0 %v977_v21  ;;  %v113_v39 = vld [vmem:[%s1349_s1 + $0x280] sm:$0xff]  ;;  %v1049_v41 = vld [vmem:[%s1348_s0 + $0x28] sm:$0xff]  ;;  %v1056_v42 = vld [vmem:[%s1348_s0 + $0x50] sm:$0xff] }
  0x33   :  { %233 = vmatpush.msrb.mxu0 %v104_v22  ;;  %256 = vmatpush.msrb.mxu1 %v120_v23  ;;  %v1044_v40 = vld [vmem:[%s1348_s0 + $0x20] sm:$0xff]  ;;  %v1061_v43 = vld [vmem:[%s1348_s0 + $0x58] sm:$0xff]  ;;  %v401_v7 = vld [vmem:[%s1351_s3 + $0x150] sm:$0xff] }
  0x34   :  { %221 = vmatmul.f32.gmra.mxu3 %v988_v24  ;;  %175 = vmatmul.f32.gmra.mxu1 %v993_v25  ;;  %v641_v46 = vld [vmem:[%s1350_s2] ss:$0 sm:$0xff]  ;;  %v402_v10 = vld [vmem:[%s1351_s3 + $0x158] sm:$0xff]  ;;  %v1086_v11 = vld [vmem:[%s1351_s3 + $0x170] sm:$0xff] }
  0x35   :  { %234 = vmatpush.msrb.mxu0 %v103_v26  ;;  %257 = vmatpush.msrb.mxu1 %v119_v27  ;;  %v1095_v17 = vld [vmem:[%s1351_s3 + $0x178] sm:$0xff]  ;;  %v395_v18 = vld [vmem:[%s1351_s3 + $0x120] sm:$0xff]  ;;  %v396_v19 = vld [vmem:[%s1351_s3 + $0x128] sm:$0xff] }
  0x36   :  { %436 = vmatpush.msrb.mxu2 %v401_v7  ;;  %459 = vmatpush.msrb.mxu3 %v402_v10  ;;  %v1108_v22 = vld [vmem:[%s1351_s3 + $0x140] sm:$0xff]  ;;  %v1113_v27 = vld [vmem:[%s1351_s3 + $0x148] sm:$0xff] }
  0x37   :  { %235 = vmatpush.msrb.mxu0 %v102_v28  ;;  %258 = vmatpush.msrb.mxu1 %v118_v29  ;;  %v389_v29 = vld [vmem:[%s1351_s3 + $0xf0] sm:$0xff]  ;;  %v359_v10 = vld [vmem:[%s1351_s3] sm:$0xff] }
  0x38   :  { %437 = vmatpush.msrb.mxu2 %v395_v18  ;;  %460 = vmatpush.msrb.mxu3 %v396_v19  ;;  %v1237_v19 = vld [vmem:[%s1351_s3 + $0x28] sm:$0xff] }
  0x39   :  { %236 = vmatpush.msrb.mxu0 %v101_v30  ;;  %259 = vmatpush.msrb.mxu1 %v117_v31  ;;  %v390_v30 = vld [vmem:[%s1351_s3 + $0xf8] sm:$0xff]  ;;  %v1129_v31 = vld [vmem:[%s1351_s3 + $0x110] sm:$0xff] }
  0x3a   :  { %438 = vmatpush.msrb.mxu2 %v389_v29  ;;  %461 = vmatpush.msrb.mxu3 %v390_v30  ;;  %v403_v29 = vld [vmem:[%s1351_s3 + $0x160] sm:$0xff]  ;;  %v404_v30 = vld [vmem:[%s1351_s3 + $0x168] sm:$0xff] }
  0x3b   :  { %237 = vmatpush.msrb.mxu0 %v100_v32  ;;  %260 = vmatpush.msrb.mxu1 %v116_v33 }
  0x3d   :  { %238 = vmatpush.msrb.mxu0 %v99_v34  ;;  %261 = vmatpush.msrb.mxu1 %v115_v35  ;;  %v1136_v34 = vld [vmem:[%s1351_s3 + $0x118] sm:$0xff] }
  0x3f   :  { %239 = vmatpush.msrb.mxu0 %v98_v36  ;;  %262 = vmatpush.msrb.mxu1 %v114_v37  ;;  %v383_v36 = vld [vmem:[%s1351_s3 + $0xc0] sm:$0xff]  ;;  %v384_v37 = vld [vmem:[%s1351_s3 + $0xc8] sm:$0xff] }
  0x40   :  { %439 = vmatpush.msrb.mxu2 %v383_v36  ;;  %462 = vmatpush.msrb.mxu3 %v384_v37  ;;  %v397_v36 = vld [vmem:[%s1351_s3 + $0x130] sm:$0xff]  ;;  %v398_v37 = vld [vmem:[%s1351_s3 + $0x138] sm:$0xff] }
  0x41   :  { %240 = vmatpush.msrb.mxu0 %v97_v38  ;;  %263 = vmatpush.msrb.mxu1 %v113_v39  ;;  %v1151_v38 = vld [vmem:[%s1351_s3 + $0xe0] sm:$0xff] }
  0x42   :  { %241 = vmatmul.f32.vlgmr.msrb.gmra.mxu0 %v1044_v40  ;;  %264 = vmatmul.f32.vlgmr.msrb.gmra.mxu1 %v1049_v41 }
  0x43   :  { %528 = vmatpush.msra.mxu0 %v1086_v11  ;;  %551 = vmatpush.msra.mxu1 %v1095_v17 }
  0x45   :  { %529 = vmatpush.msra.mxu0 %v1108_v22  ;;  %552 = vmatpush.msra.mxu1 %v1113_v27 }
  0x47   :  { %530 = vmatpush.msra.mxu0 %v1129_v31  ;;  %553 = vmatpush.msra.mxu1 %v1136_v34 }
  0x49   :  { %531 = vmatpush.msra.mxu0 %v1151_v38 }
  0x4a   :  { %244 = vmatmul.f32.gmra.mxu0 %v1056_v42  ;;  %267 = vmatmul.f32.gmra.mxu1 %v1061_v43 }
  0xa7   :  { %v150_v44 = vpop.f32.mrf.mxu0 }
  0xa8   :  { %v151_v47 = vadd.f32 %v641_v46, %v150_v44  ;;  %v1156_v44 = vld [vmem:[%s1351_s3 + $0xe8] sm:$0xff] }
  0xa9   :  { %v173_v45 = vpop.f32.mrf.mxu1  ;;  %554 = vmatpush.msra.mxu1 %v1156_v44 }
  0xaa   :  { %v174_v51 = vadd.f32 %v173_v45, %v151_v47  ;;  %v377_v47 = vld [vmem:[%s1351_s3 + $0x90] sm:$0xff] }
  0xab   :  { %440 = vmatpush.msrb.mxu2 %v377_v47 }
  0xad   :  { %v196_v48 = vpop.f32.mrf.mxu2 }
  0xae   :  { %v197_v53 = vadd.f32 %v196_v48, %v174_v51  ;;  %v378_v48 = vld [vmem:[%s1351_s3 + $0x98] sm:$0xff] }
  0xaf   :  { %v153_v49 = vpop.f32.mrf.mxu0  ;;  %v219_v52 = vpop.f32.mrf.mxu3  ;;  %463 = vmatpush.msrb.mxu3 %v378_v48  ;;  %v1177_v51 = vld [vmem:[%s1351_s3 + $0xb8] sm:$0xff]  ;;  %v391_v48 = vld [vmem:[%s1351_s3 + $0x100] sm:$0xff] }
  0xb0   :  { %v154_v54 = vadd.f32 %v641_v46, %v153_v49  ;;  %v220_v55 = vadd.f32 %v219_v52, %v197_v53  ;;  %v1171_v49 = vld [vmem:[%s1351_s3 + $0xb0] sm:$0xff]  ;;  %555 = vmatpush.msra.mxu1 %v1177_v51 }
  0xb1   :  { %v176_v50 = vpop.f32.mrf.mxu1  ;;  %532 = vmatpush.msra.mxu0 %v1171_v49 }
  0xb2   :  { %v177_v56 = vadd.f32 %v176_v50, %v154_v54  ;;  %v371_v54 = vld [vmem:[%s1351_s3 + $0x60] sm:$0xff] }
  0xb3   :  { %441 = vmatpush.msrb.mxu2 %v371_v54  ;;  %v386_v54 = vld [vmem:[%s1351_s3 + $0xd8] sm:$0xff] }
  0xb5   :  { %v199_v57 = vpop.f32.mrf.mxu2 }
  0xb6   :  { %v200_v61 = vadd.f32 %v199_v57, %v177_v56  ;;  %v1192_v57 = vld [vmem:[%s1351_s3 + $0x80] sm:$0xff] }
  0xb7   :  { %v222_v63 = vpop.f32.mrf.mxu3  ;;  %533 = vmatpush.msra.mxu0 %v1192_v57 }
  0xb8   :  { %v223_v1 = vadd.f32 %v222_v63, %v200_v61  ;;  %v365_v63 = vld [vmem:[%s1351_s3 + $0x30] sm:$0xff] }
  0xb9   :  { %442 = vmatpush.msrb.mxu2 %v365_v63  ;;  %v373_v63 = vld [vmem:[%s1351_s3 + $0x70] sm:$0xff] }
  0xbb   :  { %443 = vmatpush.msrb.mxu2 %v359_v10  ;;  %v368_v10 = vld [vmem:[%s1351_s3 + $0x48] sm:$0xff] }
  0xbd   :  { %482 = vmatpush.msra.mxu2 %v403_v29  ;;  %v361_v29 = vld [vmem:[%s1351_s3 + $0x10] sm:$0xff] }
  0xbf   :  { %v242_v58 = vpop.f32.mrf.mxu0  ;;  %v265_v59 = vpop.f32.mrf.mxu1  ;;  %483 = vmatpush.msra.mxu2 %v397_v36 }
  0xc0   :  { %v243_v60 = vadd.f32 %v242_v58, %v220_v55  ;;  %v372_v55 = vld [vmem:[%s1351_s3 + $0x68] sm:$0xff] }
  0xc1   :  { %464 = vmatpush.msrb.mxu3 %v372_v55  ;;  %v1197_v58 = vld [vmem:[%s1351_s3 + $0x88] sm:$0xff]  ;;  %484 = vmatpush.msra.mxu2 %v391_v48 }
  0xc2   :  { %v1068_v62 = vadd.f32 %v265_v59, %v243_v60  ;;  %556 = vmatpush.msra.mxu1 %v1197_v58 }
  0xc4   :  { %v1071_v0 = vmul.f32 0.70710677, %v1068_v62 }
  0xc6   :  { %v275_v2 = vmul.f32 %v1071_v0, %v1071_v0 }
  0xc7   :  { %v245_v3 = vpop.f32.mrf.mxu0  ;;  %v268_v4 = vpop.f32.mrf.mxu1 }
  0xc8   :  { %v1075_v5 = vmin.f32 %v275_v2, 16.0  ;;  %v246_v6 = vadd.f32 %v245_v3, %v223_v1  ;;  %v366_v1 = vld [vmem:[%s1351_s3 + $0x38] sm:$0xff]  ;;  %v1212_v3 = vld [vmem:[%s1351_s3 + $0x50] sm:$0xff] }
  0xc9   :  { %465 = vmatpush.msrb.mxu3 %v366_v1  ;;  %534 = vmatpush.msra.mxu0 %v1212_v3  ;;  %v374_v1 = vld [vmem:[%s1351_s3 + $0x78] sm:$0xff] }
  0xca   :  { %v277_v14 = vmul.f32 2.1237322e-06, %v1075_v5  ;;  %v288_v15 = vmul.f32 3.8918573e-05, %v1075_v5  ;;  %v1090_v16 = vadd.f32 %v268_v4, %v246_v6  ;;  %v1217_v4 = vld [vmem:[%s1351_s3 + $0x58] sm:$0xff] }
  0xcb   :  { %557 = vmatpush.msra.mxu1 %v1217_v4 }
  0xcc   :  { %v278_v23 = vadd.f32 0.00028619796, %v277_v14  ;;  %v289_v26 = vadd.f32 0.001143296, %v288_v15  ;;  %v1116_v28 = vmul.f32 0.70710677, %v1090_v16 }
  0xcd   :  { %v360_v14 = vld [vmem:[%s1351_s3 + $0x8] sm:$0xff]  ;;  %v1232_v15 = vld [vmem:[%s1351_s3 + $0x20] sm:$0xff]  ;;  %558 = vmatpush.msra.mxu1 %v1237_v19 }
  0xce   :  { %v279_v32 = vmul.f32 %v278_v23, %v1075_v5  ;;  %v290_v33 = vmul.f32 %v289_v26, %v1075_v5  ;;  %v315_v35 = vmul.f32 %v1116_v28, %v1116_v28  ;;  %466 = vmatpush.msrb.mxu3 %v360_v14  ;;  %535 = vmatpush.msra.mxu0 %v1232_v15 }
  0xd0   :  { %v291_v39 = vadd.f32 0.014752088, %v290_v33  ;;  %v280_v45 = vadd.f32 0.0036580483, %v279_v32  ;;  %v1158_v46 = vmin.f32 %v315_v35, 16.0  ;;  %505 = vmatpush.msra.mxu3 %v404_v30  ;;  %v362_v30 = vld [vmem:[%s1351_s3 + $0x18] sm:$0xff] }
  0xd2   :  { %v292_v50 = vmul.f32 %v291_v39, %v1075_v5  ;;  %v317_v52 = vmul.f32 2.1237322e-06, %v1158_v46  ;;  %v328_v53 = vmul.f32 3.8918573e-05, %v1158_v46  ;;  %v281_v59 = vmul.f32 %v280_v45, %v1075_v5  ;;  %506 = vmatpush.msra.mxu3 %v398_v37 }
  0xd4   :  { %v293_v56 = vadd.f32 0.112945676, %v292_v50  ;;  %v318_v60 = vadd.f32 0.00028619796, %v317_v52  ;;  %v329_v61 = vadd.f32 0.001143296, %v328_v53 }
  0xd5   :  { %v282_v23 = vadd.f32 0.05243302, %v281_v59  ;;  %v392_v50 = vld [vmem:[%s1351_s3 + $0x108] sm:$0xff]  ;;  %v385_v53 = vld [vmem:[%s1351_s3 + $0xd0] sm:$0xff] }
  0xd6   :  { %v294_v2 = vmul.f32 %v293_v56, %v1075_v5  ;;  %v319_v6 = vmul.f32 %v318_v60, %v1158_v46  ;;  %v330_v7 = vmul.f32 %v329_v61, %v1158_v46  ;;  %507 = vmatpush.msra.mxu3 %v392_v50  ;;  %485 = vmatpush.msra.mxu2 %v385_v53  ;;  %v379_v56 = vld [vmem:[%s1351_s3 + $0xa0] sm:$0xff]  ;;  %v380_v59 = vld [vmem:[%s1351_s3 + $0xa8] sm:$0xff] }
  0xd7   :  { %v283_v45 = vmul.f32 %v282_v23, %v1075_v5 }
  0xd8   :  { %v295_v18 = vadd.f32 0.4994258, %v294_v2  ;;  %v331_v26 = vadd.f32 0.014752088, %v330_v7  ;;  %v320_v33 = vadd.f32 0.0036580483, %v319_v6  ;;  %508 = vmatpush.msra.mxu3 %v386_v54  ;;  %486 = vmatpush.msra.mxu2 %v379_v56 }
  0xd9   :  { %v284_v60 = vadd.f32 0.18741608, %v283_v45  ;;  %v367_v7 = vld [vmem:[%s1351_s3 + $0x40] sm:$0xff] }
  0xda   :  { %v296_v32 = vmul.f32 %v295_v18, %v1075_v5  ;;  %v332_v35 = vmul.f32 %v331_v26, %v1158_v46  ;;  %v321_v52 = vmul.f32 %v320_v33, %v1158_v46  ;;  %509 = vmatpush.msra.mxu3 %v380_v59  ;;  %487 = vmatpush.msra.mxu2 %v373_v63 }
  0xdb   :  { %v285_v18 = vmul.f32 %v284_v60, %v1075_v5 }
  0xdc   :  { %v297_v39 = vadd.f32 1.0, %v296_v32  ;;  %v333_v47 = vadd.f32 0.112945676, %v332_v35  ;;  %v322_v2 = vadd.f32 0.05243302, %v321_v52  ;;  %510 = vmatpush.msra.mxu3 %v374_v1  ;;  %488 = vmatpush.msra.mxu2 %v367_v7 }
  0xdd   :  { %v286_v5 = vadd.f32 1.1283791, %v285_v18 }
  0xde   :  { %642 = vrcp.f32 %v297_v39  ;;  %v334_v55 = vmul.f32 %v333_v47, %v1158_v46  ;;  %v323_v32 = vmul.f32 %v322_v2, %v1158_v46  ;;  %511 = vmatpush.msra.mxu3 %v368_v10  ;;  %v309_v35 = vand.u32 2147483648, %v297_v39  ;;  %489 = vmatpush.msra.mxu2 %v361_v29 }
  0xdf   :  { %v307_v37 = vand.u32 2147483647, %v297_v39  ;;  %vm303_vm1 = vweird.f32 %v297_v39  ;;  %v287_v52 = vmul.f32 %v286_v5, %v1071_v0 }
  0xe0   :  { %v335_v61 = vadd.f32 0.4994258, %v334_v55  ;;  %512 = vmatpush.msra.mxu3 %v362_v30  ;;  %v324_v45 = vadd.f32 0.18741608, %v323_v32  ;;  %v310_v48 = vor.u32 1.1754944e-38, %v309_v35 }
  0xe1   :  { %vm308_vm3 = vcmp.eq.f32.partialorder %v307_v37, 8.507059e+37 }
  0xe2   :  { %v336_v6 = vmul.f32 %v335_v61, %v1158_v46  ;;  %v325_v55 = vmul.f32 %v324_v45, %v1158_v46 }
  0xe4   :  { %v643_v14 = vpop.eup %642  ;;  %v337_v26 = vadd.f32 1.0, %v336_v6  ;;  %v326_v1 = vadd.f32 1.1283791, %v325_v55 }
  0xe5   :  { %v299_v23 = vmul.f32 %v643_v14, %v297_v39  ;;  %vm304_vm0 = vweird.f32 %v643_v14  ;;  %v271_v39 = vmul.f32 0.5, %v1068_v62 }
  0xe6   :  { %644 = vrcp.f32 %v337_v26  ;;  %vm305_vm2 = vmor %vm303_vm1, %vm304_vm0  ;;  %v349_v63 = vand.u32 2147483648, %v337_v26  ;;  %v347_v6 = vand.u32 2147483647, %v337_v26  ;;  %vm343_vm5 = vweird.f32 %v337_v26 }
  0xe7   :  { %v300_v33 = vsub.f32 1.0, %v299_v23  ;;  %v327_v46 = vmul.f32 %v326_v1, %v1116_v28  ;;  %v272_v28 = vmul.f32 0.5, %v1090_v16 }
  0xe8   :  { %vm348_vm8 = vcmp.eq.f32.partialorder %v347_v6, 8.507059e+37 }
  0xe9   :  { %v301_v36 = vmul.f32 %v643_v14, %v300_v33 }
  0xeb   :  { %v302_v47 = vadd.f32 %v643_v14, %v301_v36 }
  0xec   :  { %v645_v50 = vpop.eup %644 }
  0xed   :  { %v306_v53 = vsel %vm305_vm2, %v643_v14, %v302_v47  ;;  %v339_v56 = vmul.f32 %v645_v50, %v337_v26  ;;  %vm344_vm4 = vweird.f32 %v645_v50  ;;  %v350_v14 = vor.u32 1.1754944e-38, %v349_v63 }
  0xee   :  { %v311_v54 = vsel %vm308_vm3, %v310_v48, %v306_v53  ;;  %vm345_vm7 = vmor %vm343_vm5, %vm344_vm4 }
  0xef   :  { %v312_v59 = vmul.f32 %v311_v54, %v287_v52  ;;  %v340_v60 = vsub.f32 1.0, %v339_v56 }
  0xf1   :  { %v608_v61 = vclamps-f32 %v312_v59, 1.0  ;;  %v341_v2 = vmul.f32 %v645_v50, %v340_v60 }
  0xf3   :  { %v355_v7 = vadd.f32 1.0, %v608_v61  ;;  %v342_v10 = vadd.f32 %v645_v50, %v341_v2 }
  0xf5   :  { %v357_v0 = vmul.f32 %v355_v7, %v271_v39  ;;  %v346_v18 = vsel %vm345_vm7, %v645_v50, %v342_v10 }
  0xf6   :  { %v351_v23 = vsel %vm348_vm8, %v350_v14, %v346_v18 }
  0xf7   :  { %610 = vmatmul.msk.f32.vlgmr.msrb.gmra.mxu2 %vm421_vm6, %v357_v0  ;;  %612 = vmatmul.msk.f32.vlgmr.msrb.gmra.mxu3 %vm421_vm6, %v357_v0  ;;  %v352_v29 = vmul.f32 %v351_v23, %v327_v46 }
  0xf8   :  { %618 = vmatmul.msk.f32.vlgmr.msra.gmra.mxu0 %vm421_vm6, %v357_v0  ;;  %620 = vmatmul.msk.f32.vlgmr.msra.gmra.mxu1 %vm421_vm6, %v357_v0 }
  0xf9   :  { %622 = vmatpush.msrb.mxu2 %v1086_v11  ;;  %630 = vmatpush.msrb.mxu3 %v1095_v17  ;;  %v609_v62 = vclamps-f32 %v352_v29, 1.0  ;;  %v407_v11 = vld [vmem:[%s1352_s4] sm:$0x3f]  ;;  %s672_s4 = smov [#allocation2]  }
  0xfa   :  { %v413_v16 = vperm.slane %v407_v11, 4  ;;  %v414_v17 = vperm.slane %v407_v11, 5  ;;  %v411_v36 = vperm.slane %v407_v11, 2  ;;  %v412_v37 = vperm.slane %v407_v11, 3  ;;  %s594_s21 = sshll.u32 %s672_s4, 4  ;;  %s595_s21 = int_to_ptr.vmem [resolvable:$true] %s594_s21 }
  0xfb   :  { %623 = vmatpush.msrb.mxu2 %v1108_v22  ;;  %631 = vmatpush.msrb.mxu3 %v1113_v27  ;;  %v356_v26 = vadd.f32 1.0, %v609_v62 }
  0xfd   :  { %624 = vmatpush.msrb.mxu2 %v1129_v31  ;;  %632 = vmatpush.msrb.mxu3 %v1136_v34  ;;  %v358_v30 = vmul.f32 %v356_v26, %v272_v28 }
  0xff   :  { %625 = vmatpush.msrb.mxu2 %v1151_v38  ;;  %633 = vmatpush.msrb.mxu3 %v1156_v44  ;;  %v409_v38 = vperm.slane %v407_v11, 0  ;;  %v410_v44 = vperm.slane %v407_v11, 1 }
 0x100   :  { %611 = vmatmul.msk.f32.gmra.mxu2 %vm421_vm6, %v358_v30  ;;  %613 = vmatmul.msk.f32.gmra.mxu3 %vm421_vm6, %v358_v30 }
 0x101   :  { %626 = vmatpush.msrb.mxu2 %v1171_v49  ;;  %634 = vmatpush.msrb.mxu3 %v1177_v51 }
 0x103   :  { %627 = vmatpush.msrb.mxu2 %v1192_v57  ;;  %635 = vmatpush.msrb.mxu3 %v1197_v58 }
 0x105   :  { %628 = vmatpush.msrb.mxu2 %v1212_v3  ;;  %636 = vmatpush.msrb.mxu3 %v1217_v4 }
 0x107   :  { %629 = vmatpush.msrb.mxu2 %v1232_v15  ;;  %637 = vmatpush.msrb.mxu3 %v1237_v19 }
 0x108   :  { %614 = vmatmul.msk.f32.vlgmr.msra.gmra.mxu2 %vm421_vm6, %v357_v0  ;;  %616 = vmatmul.msk.f32.vlgmr.msra.gmra.mxu3 %vm421_vm6, %v357_v0 }
 0x110   :  { %615 = vmatmul.msk.f32.gmra.mxu2 %vm421_vm6, %v358_v30  ;;  %617 = vmatmul.msk.f32.gmra.mxu3 %vm421_vm6, %v358_v30 }
 0x118   :  { %619 = vmatmul.msk.f32.vlgmr.msrb.gmra.mxu2 %vm421_vm6, %v358_v30  ;;  %621 = vmatmul.msk.f32.vlgmr.msrb.gmra.mxu3 %vm421_vm6, %v358_v30 }
 0x175   :  { %v537_v22 = vpop.f32.mrf.mxu0  ;;  %v560_v27 = vpop.f32.mrf.mxu1 }
 0x176   :  { %v538_v31 = vadd.f32 %v537_v22, %v413_v16  ;;  %v561_v34 = vadd.f32 %v560_v27, %v414_v17 }
 0x178   :  { %v570_v49 = vadd.f32 %v538_v31, %v1044_v40  ;;  %v571_v51 = vadd.f32 %v561_v34, %v1049_v41 }
 0x17a   :  { %582 = vst [vmem:[#allocation2 + $0x20] sm:$0xff] %v570_v49  ;;  %v445_v57 = vpop.f32.mrf.mxu2  ;;  %v468_v58 = vpop.f32.mrf.mxu3 }
 0x17b   :  { %583 = vst [vmem:[#allocation2 + $0x28] sm:$0xff] %v571_v51  ;;  %v446_v3 = vadd.f32 %v445_v57, %v409_v38  ;;  %v469_v4 = vadd.f32 %v468_v58, %v410_v44 }
 0x17d   :  { %v566_v15 = vadd.f32 %v446_v3, %v929_v9  ;;  %v567_v19 = vadd.f32 %v469_v4, %v945_v13 }
 0x17f   :  { %578 = vst [vmem:[#allocation2] sm:$0xff] %v566_v15 }
 0x180   :  { %579 = vst [vmem:[#allocation2 + $0x8] sm:$0xff] %v567_v19 }
 0x183   :  { %v448_v32 = vpop.f32.mrf.mxu2  ;;  %v471_v33 = vpop.f32.mrf.mxu3 }
 0x184   :  { %v449_v35 = vadd.f32 %v448_v32, %v409_v38  ;;  %v472_v5 = vadd.f32 %v471_v33, %v410_v44 }
 0x186   :  { %v572_v40 = vadd.f32 %v449_v35, %v977_v21  ;;  %v573_v41 = vadd.f32 %v472_v5, %v993_v25 }
 0x188   :  { %584 = vst [vmem:[#allocation2 + $0x30] sm:$0xff] %v572_v40 }
 0x189   :  { %585 = vst [vmem:[#allocation2 + $0x38] sm:$0xff] %v573_v41 }
 0x18b   :  { %v491_v45 = vpop.f32.mrf.mxu2  ;;  %v514_v47 = vpop.f32.mrf.mxu3 }
 0x18c   :  { %v492_v48 = vadd.f32 %v491_v45, %v411_v36  ;;  %v515_v9 = vadd.f32 %v514_v47, %v412_v37 }
 0x18e   :  { %v568_v13 = vadd.f32 %v492_v48, %v924_v8  ;;  %v569_v50 = vadd.f32 %v515_v9, %v940_v12 }
 0x190   :  { %580 = vst [vmem:[#allocation2 + $0x10] sm:$0xff] %v568_v13 }
 0x191   :  { %581 = vst [vmem:[#allocation2 + $0x18] sm:$0xff] %v569_v50 }
 0x193   :  { %v494_v52 = vpop.f32.mrf.mxu2  ;;  %v517_v53 = vpop.f32.mrf.mxu3 }
 0x194   :  { %v495_v54 = vadd.f32 %v494_v52, %v411_v36  ;;  %v518_v21 = vadd.f32 %v517_v53, %v412_v37 }
 0x196   :  { %v574_v25 = vadd.f32 %v495_v54, %v972_v20  ;;  %v575_v55 = vadd.f32 %v518_v21, %v988_v24 }
 0x198   :  { %586 = vst [vmem:[#allocation2 + $0x40] sm:$0xff] %v574_v25 }
 0x199   :  { %587 = vst [vmem:[#allocation2 + $0x48] sm:$0xff] %v575_v55 }
 0x19b   :  { %v540_v56 = vpop.f32.mrf.mxu2  ;;  %v563_v59 = vpop.f32.mrf.mxu3 }
 0x19c   :  { %v541_v8 = vadd.f32 %v540_v56, %v413_v16  ;;  %v564_v12 = vadd.f32 %v563_v59, %v414_v17 }
 0x19e   :  { %v576_v60 = vadd.f32 %v541_v8, %v1056_v42  ;;  %v577_v61 = vadd.f32 %v564_v12, %v1061_v43 }
 0x1a0   :  { %588 = vst [vmem:[#allocation2 + $0x50] sm:$0xff] %v576_v60 }
 0x1a1   :  { %589 = vst [vmem:[#allocation2 + $0x58] sm:$0xff] %v577_v61 }
 0x1a2   :  { %602 = dma.vmem_to_hbm [thread:$0]  %s595_s21, 1536, %s597_s24, [#allocation3], %s673_s25, %s673_s25, %s674_s26  }
 0x1a3   :  { %670 = dma.done.wait [#allocation3], 1536  }
 0x1a4   :  { %671 = vsyncadd [#allocation3], 4294965760 }
 0x1a5   :  { %607 = vsyncpa [#allocation3], 1 }

</bundles_post_ra>
